<compile_context>
chip_gen: v7x
topology: tpu7x:2x2x1
jax: 0.10.0
libtpu: 0.0.40
codegen_flags: <defaults>
</compile_context>

<pallas_src>
import jax
import jax.numpy as jnp
import numpy as np
from jax.experimental import pallas as pl
from jax.experimental.pallas import tpu as pltpu

INPUT_DIM = 2
HIDDEN_DIM = 10
NUM_CLASSES = 2
DROPOUT_P = 0.2

MAX_TILE_N = 8192                      # upper bound for the batch tile (lane axis)
_VMEM_BUDGET_BYTES = 8 * 1024 * 1024   # conservative; well under every chip's scoped VMEM


def _round_up(x, m):
    return ((x + m - 1) // m) * m


def _choose_tile_n(n, num_samples):
    """Pick the batch-tile (lane) size.

    Large tiles amortize the ~0.35us per-grid-step overhead; the cap keeps the
    double-buffered x/mask/out blocks + f32 intermediates under a small VMEM
    budget for any num_samples, and we prefer >= 2 grid steps so both v7x
    TensorCores get work on the "parallel" axis.
    """
    per_lane_bytes = (
        2 * 4 * INPUT_DIM                                     # x block (double-buffered)
        + 2 * 4 * num_samples * (HIDDEN_DIM + NUM_CLASSES)    # keep-mask + out blocks
        + 4 * 4 * HIDDEN_DIM                                  # f32 intermediates slack
    )
    vmem_cap = max(128, (_VMEM_BUDGET_BYTES // per_lane_bytes) // 128 * 128)
    n128 = _round_up(n, 128)
    tile = min(MAX_TILE_N, vmem_cap, n128)
    if tile == n128 and n128 >= 256:   # split so v7x's two TCs both get a step
        tile = _round_up(n128 // 2, 128)
    return tile


def toynet_kernel(x_ref, keep_ref, w1_ref, b1_ref, w2s_ref, b2_ref, w3_ref, b3_ref,
                  out_ref):
    """One batch tile; all MC-dropout samples computed in-body.

    x_ref:    [INPUT_DIM, TILE_N]        (batch on lanes)
    keep_ref: [T, HIDDEN_DIM, TILE_N]    {0,1} dropout keep mask per sample
    w*_ref:   PyTorch layout [out, in]; b*_ref: [out, 1]; w2 pre-scaled by 1/(1-p)
    out_ref:  [T, NUM_CLASSES, TILE_N]
    """
    x = x_ref[...]

    # fc1 + ReLU — shared across all MC samples, computed once per tile.
    h1 = jnp.dot(w1_ref[...], x, preferred_element_type=jnp.float32) + b1_ref[...]
    h1 = jnp.maximum(h1, 0.0)                              # [H, TILE_N]

    w2s = w2s_ref[...]
    b2 = b2_ref[...]
    w3 = w3_ref[...]
    b3 = b3_ref[...]

    num_samples = out_ref.shape[0]
    for t in range(num_samples):                           # tiny static trip count
        # Dropout: inverted 1/(1-p) scale is folded into w2s -> a single multiply.
        h1d = h1 * keep_ref[t]
        h2 = jnp.dot(w2s, h1d, preferred_element_type=jnp.float32) + b2
        h2 = jnp.maximum(h2, 0.0)
        logits = jnp.dot(w3, h2, preferred_element_type=jnp.float32) + b3
        out_ref[t] = logits.astype(out_ref.dtype)


def toynet_forward(x, params, key, num_samples=1):
    """MC-dropout forward pass.

    x: [N, INPUT_DIM] float32; params in PyTorch layout (w: [out, in], b: [out]).
    Returns logits in lane-dense layout [num_samples, NUM_CLASSES, N]
    (PyTorch-layout logits = transpose(result, (0, 2, 1)), left to the consumer).
    """
    assert num_samples >= 1
    x = jnp.asarray(x, jnp.float32)
    n = x.shape[0]

    tile_n = _choose_tile_n(n, num_samples)
    n_pad = _round_up(n, tile_n)
    num_tiles = n_pad // tile_n

    xt = x.T                                               # [INPUT_DIM, N], batch on lanes
    # {0,1} keep mask generated outside the kernel (portable: no pltpu.prng_*).
    keep = jax.random.bernoulli(
        key, 1.0 - DROPOUT_P, (num_samples, HIDDEN_DIM, n)).astype(jnp.float32)
    if n_pad != n:
        xt = jnp.pad(xt, ((0, 0), (0, n_pad - n)))
        keep = jnp.pad(keep, ((0, 0), (0, 0), (0, n_pad - n)))

    w1 = jnp.asarray(params["w1"], jnp.float32)
    b1 = jnp.asarray(params["b1"], jnp.float32).reshape(HIDDEN_DIM, 1)
    # Fold the dropout inverted scale into w2 once on the host (10x10 scale).
    w2s = jnp.asarray(params["w2"], jnp.float32) * np.float32(1.0 / (1.0 - DROPOUT_P))
    b2 = jnp.asarray(params["b2"], jnp.float32).reshape(HIDDEN_DIM, 1)
    w3 = jnp.asarray(params["w3"], jnp.float32)
    b3 = jnp.asarray(params["b3"], jnp.float32).reshape(NUM_CLASSES, 1)

    def resident(shape):
        # Full (tiny) array, constant block index -> DMA'd once, stays in VMEM.
        rank = len(shape)
        return pl.BlockSpec(shape, lambda i: (0,) * rank)

    out = pl.pallas_call(
        toynet_kernel,
        out_shape=jax.ShapeDtypeStruct((num_samples, NUM_CLASSES, n_pad), jnp.float32),
        grid=(num_tiles,),
        in_specs=[
            pl.BlockSpec((INPUT_DIM, tile_n), lambda i: (0, i)),                   # x
            pl.BlockSpec((num_samples, HIDDEN_DIM, tile_n), lambda i: (0, 0, i)),  # keep
            resident((HIDDEN_DIM, INPUT_DIM)),                                     # w1
            resident((HIDDEN_DIM, 1)),                                             # b1
            resident((HIDDEN_DIM, HIDDEN_DIM)),                                    # w2*scale
            resident((HIDDEN_DIM, 1)),                                             # b2
            resident((NUM_CLASSES, HIDDEN_DIM)),                                   # w3
            resident((NUM_CLASSES, 1)),                                            # b3
        ],
        out_specs=pl.BlockSpec((num_samples, NUM_CLASSES, tile_n),
                               lambda i: (0, 0, i)),
        compiler_params=pltpu.CompilerParams(dimension_semantics=("parallel",)),
    )(xt, keep, w1, b1, w2s, b2, w3, b3)

    return out[:, :, :n]   # [T, NUM_CLASSES, N] — lane-dense, no wrapper transpose


def _reference_forward(x, params, keep):
    """Pure-jnp reference matching the PyTorch forward for a given keep mask.
    keep: [T, HIDDEN_DIM, N] in {0,1}. Returns [T, N, NUM_CLASSES]."""
    hp = jax.lax.Precision.HIGHEST
    h1 = jnp.maximum(jnp.dot(x, params["w1"].T, precision=hp) + params["b1"], 0.0)
    h1 = h1[None, :, :] * jnp.transpose(keep, (0, 2, 1)) / (1.0 - DROPOUT_P)
    h2 = jnp.maximum(jnp.dot(h1, params["w2"].T, precision=hp) + params["b2"], 0.0)
    return jnp.dot(h2, params["w3"].T, precision=hp) + params["b3"]


def init_params(key):
    """Deterministic init in PyTorch nn.Linear layout: w [out, in], b [out]."""
    k1, k2, k3, k4, k5, k6 = jax.random.split(key, 6)

    def uniform(k, shape, fan_in):
        bound = 1.0 / np.sqrt(fan_in)
        return jax.random.uniform(k, shape, jnp.float32, -bound, bound)

    return {
        "w1": uniform(k1, (HIDDEN_DIM, INPUT_DIM), INPUT_DIM),
        "b1": uniform(k2, (HIDDEN_DIM,), INPUT_DIM),
        "w2": uniform(k3, (HIDDEN_DIM, HIDDEN_DIM), HIDDEN_DIM),
        "b2": uniform(k4, (HIDDEN_DIM,), HIDDEN_DIM),
        "w3": uniform(k5, (NUM_CLASSES, HIDDEN_DIM), HIDDEN_DIM),
        "b3": uniform(k6, (NUM_CLASSES,), HIDDEN_DIM),
    }


if __name__ == "__main__":
    key = jax.random.PRNGKey(0)
    k_param, k_x, k_drop = jax.random.split(key, 3)

    params = init_params(k_param)
    batch = 8
    num_mc_samples = 4
    x = jax.random.normal(k_x, (batch, INPUT_DIM), dtype=jnp.float32)

    logits = toynet_forward(x, params, k_drop, num_samples=num_mc_samples)
    logits = jax.block_until_ready(logits)

    assert logits.shape == (num_mc_samples, NUM_CLASSES, batch)
    assert logits.dtype == jnp.float32
    assert bool(jnp.all(jnp.isfinite(logits)))

    # Correctness check against a pure-jnp reference using the exact same
    # dropout mask (same key / shape as inside toynet_forward).
    keep_ref = jax.random.bernoulli(
        k_drop, 1.0 - DROPOUT_P,
        (num_mc_samples, HIDDEN_DIM, batch)).astype(jnp.float32)
    ref = _reference_forward(x, params, keep_ref)            # [T, N, C]
    got = jnp.transpose(logits, (0, 2, 1))                   # [T, N, C] (test-only)
    assert bool(jnp.allclose(got, ref, atol=5e-3, rtol=5e-3))

    # TODO(synk): model/checkpoint directory creation from the PyTorch module is
    # filesystem I/O and intentionally not reproduced.
    print("KERNEL_OK")
</pallas_src>

<mosaic_0001>
module attributes {stable_mosaic.version = 11 : i64} {
  func.func @toynet_kernel(%arg0: i32, %arg1: memref<2x128xf32, #tpu.memory_space<vmem>>, %arg2: memref<4x10x128xf32, #tpu.memory_space<vmem>>, %arg3: memref<10x2xf32, #tpu.memory_space<vmem>>, %arg4: memref<10x1xf32, #tpu.memory_space<vmem>>, %arg5: memref<10x10xf32, #tpu.memory_space<vmem>>, %arg6: memref<10x1xf32, #tpu.memory_space<vmem>>, %arg7: memref<2x10xf32, #tpu.memory_space<vmem>>, %arg8: memref<2x1xf32, #tpu.memory_space<vmem>>, %arg9: memref<4x2x128xf32, #tpu.memory_space<vmem>>) attributes {dimension_semantics = [#tpu.dimension_semantics<parallel>], iteration_bounds = array<i64: 1>, scalar_prefetch = 0 : i64, scratch_operands = 0 : i64, tpu.core_type = #tpu.core_type<tc>, window_params = [{transform_indices = @transform_0, window_bounds = array<i64: 2, 128>}, {transform_indices = @transform_1, window_bounds = array<i64: 4, 10, 128>}, {pipeline_mode = #tpu.pipeline_mode<synchronous>, transform_indices = @transform_2, window_bounds = array<i64: 10, 2>}, {pipeline_mode = #tpu.pipeline_mode<synchronous>, transform_indices = @transform_3, window_bounds = array<i64: 10, 1>}, {pipeline_mode = #tpu.pipeline_mode<synchronous>, transform_indices = @transform_4, window_bounds = array<i64: 10, 10>}, {pipeline_mode = #tpu.pipeline_mode<synchronous>, transform_indices = @transform_5, window_bounds = array<i64: 10, 1>}, {pipeline_mode = #tpu.pipeline_mode<synchronous>, transform_indices = @transform_6, window_bounds = array<i64: 2, 10>}, {pipeline_mode = #tpu.pipeline_mode<synchronous>, transform_indices = @transform_7, window_bounds = array<i64: 2, 1>}, {transform_indices = @transform_8, window_bounds = array<i64: 4, 2, 128>}]} {
    %c0 = arith.constant 0 : index
    %c0_0 = arith.constant 0 : index
    %0 = vector.load %arg1[%c0, %c0_0] : memref<2x128xf32, #tpu.memory_space<vmem>>, vector<2x128xf32>
    %c0_1 = arith.constant 0 : index
    %c0_2 = arith.constant 0 : index
    %1 = vector.load %arg3[%c0_1, %c0_2] : memref<10x2xf32, #tpu.memory_space<vmem>>, vector<10x2xf32>
    %cst = arith.constant dense<0.000000e+00> : vector<10x128xf32>
    %2 = tpu.matmul %1, %0, %cst {dimension_numbers = #tpu.dot_dimension_numbers<[1], [0], [0], [1], [0, 0, 1, 1], [], []>} : vector<10x2xf32>, vector<2x128xf32>, vector<10x128xf32> -> vector<10x128xf32>
    %c0_3 = arith.constant 0 : index
    %c0_4 = arith.constant 0 : index
    %3 = vector.load %arg4[%c0_3, %c0_4] : memref<10x1xf32, #tpu.memory_space<vmem>>, vector<10x1xf32>
    %4 = vector.broadcast %3 : vector<10x1xf32> to vector<10x128xf32>
    %5 = arith.addf %2, %4 : vector<10x128xf32>
    %cst_5 = arith.constant 0.000000e+00 : f32
    %6 = vector.broadcast %cst_5 : f32 to vector<10x128xf32>
    %7 = arith.maximumf %5, %6 : vector<10x128xf32>
    %c0_6 = arith.constant 0 : index
    %c0_7 = arith.constant 0 : index
    %8 = vector.load %arg5[%c0_6, %c0_7] : memref<10x10xf32, #tpu.memory_space<vmem>>, vector<10x10xf32>
    %c0_8 = arith.constant 0 : index
    %c0_9 = arith.constant 0 : index
    %9 = vector.load %arg6[%c0_8, %c0_9] : memref<10x1xf32, #tpu.memory_space<vmem>>, vector<10x1xf32>
    %c0_10 = arith.constant 0 : index
    %c0_11 = arith.constant 0 : index
    %10 = vector.load %arg7[%c0_10, %c0_11] : memref<2x10xf32, #tpu.memory_space<vmem>>, vector<2x10xf32>
    %c0_12 = arith.constant 0 : index
    %c0_13 = arith.constant 0 : index
    %11 = vector.load %arg8[%c0_12, %c0_13] : memref<2x1xf32, #tpu.memory_space<vmem>>, vector<2x1xf32>
    %c0_14 = arith.constant 0 : index
    %c0_15 = arith.constant 0 : index
    %c0_16 = arith.constant 0 : index
    %12 = vector.load %arg2[%c0_14, %c0_15, %c0_16] : memref<4x10x128xf32, #tpu.memory_space<vmem>>, vector<1x10x128xf32>
    %13 = vector.shape_cast %12 : vector<1x10x128xf32> to vector<10x128xf32>
    %14 = arith.mulf %7, %13 : vector<10x128xf32>
    %cst_17 = arith.constant dense<0.000000e+00> : vector<10x128xf32>
    %15 = tpu.matmul %8, %14, %cst_17 {dimension_numbers = #tpu.dot_dimension_numbers<[1], [0], [0], [1], [0, 0, 1, 1], [], []>} : vector<10x10xf32>, vector<10x128xf32>, vector<10x128xf32> -> vector<10x128xf32>
    %16 = vector.broadcast %9 : vector<10x1xf32> to vector<10x128xf32>
    %17 = arith.addf %15, %16 : vector<10x128xf32>
    %cst_18 = arith.constant 0.000000e+00 : f32
    %18 = vector.broadcast %cst_18 : f32 to vector<10x128xf32>
    %19 = arith.maximumf %17, %18 : vector<10x128xf32>
    %cst_19 = arith.constant dense<0.000000e+00> : vector<2x128xf32>
    %20 = tpu.matmul %10, %19, %cst_19 {dimension_numbers = #tpu.dot_dimension_numbers<[1], [0], [0], [1], [0, 0, 1, 1], [], []>} : vector<2x10xf32>, vector<10x128xf32>, vector<2x128xf32> -> vector<2x128xf32>
    %21 = vector.broadcast %11 : vector<2x1xf32> to vector<2x128xf32>
    %22 = arith.addf %20, %21 : vector<2x128xf32>
    %c0_20 = arith.constant 0 : index
    %c0_21 = arith.constant 0 : index
    %c0_22 = arith.constant 0 : index
    %23 = vector.load %arg9[%c0_20, %c0_21, %c0_22] : memref<4x2x128xf32, #tpu.memory_space<vmem>>, vector<1x2x128xf32>
    %24 = vector.shape_cast %23 : vector<1x2x128xf32> to vector<2x128xf32>
    %25 = vector.shape_cast %22 : vector<2x128xf32> to vector<1x2x128xf32>
    tpu.vector_store %arg9[%c0_20, %c0_21, %c0_22], %25 {strides = array<i32>} : memref<4x2x128xf32, #tpu.memory_space<vmem>>, vector<1x2x128xf32>,
    %c1 = arith.constant 1 : index
    %c0_23 = arith.constant 0 : index
    %c0_24 = arith.constant 0 : index
    %26 = vector.load %arg2[%c1, %c0_23, %c0_24] : memref<4x10x128xf32, #tpu.memory_space<vmem>>, vector<1x10x128xf32>
    %27 = vector.shape_cast %26 : vector<1x10x128xf32> to vector<10x128xf32>
    %28 = arith.mulf %7, %27 : vector<10x128xf32>
    %cst_25 = arith.constant dense<0.000000e+00> : vector<10x128xf32>
    %29 = tpu.matmul %8, %28, %cst_25 {dimension_numbers = #tpu.dot_dimension_numbers<[1], [0], [0], [1], [0, 0, 1, 1], [], []>} : vector<10x10xf32>, vector<10x128xf32>, vector<10x128xf32> -> vector<10x128xf32>
    %30 = vector.broadcast %9 : vector<10x1xf32> to vector<10x128xf32>
    %31 = arith.addf %29, %30 : vector<10x128xf32>
    %cst_26 = arith.constant 0.000000e+00 : f32
    %32 = vector.broadcast %cst_26 : f32 to vector<10x128xf32>
    %33 = arith.maximumf %31, %32 : vector<10x128xf32>
    %cst_27 = arith.constant dense<0.000000e+00> : vector<2x128xf32>
    %34 = tpu.matmul %10, %33, %cst_27 {dimension_numbers = #tpu.dot_dimension_numbers<[1], [0], [0], [1], [0, 0, 1, 1], [], []>} : vector<2x10xf32>, vector<10x128xf32>, vector<2x128xf32> -> vector<2x128xf32>
    %35 = vector.broadcast %11 : vector<2x1xf32> to vector<2x128xf32>
    %36 = arith.addf %34, %35 : vector<2x128xf32>
    %c1_28 = arith.constant 1 : index
    %c0_29 = arith.constant 0 : index
    %c0_30 = arith.constant 0 : index
    %37 = vector.load %arg9[%c1_28, %c0_29, %c0_30] : memref<4x2x128xf32, #tpu.memory_space<vmem>>, vector<1x2x128xf32>
    %38 = vector.shape_cast %37 : vector<1x2x128xf32> to vector<2x128xf32>
    %39 = vector.shape_cast %36 : vector<2x128xf32> to vector<1x2x128xf32>
    tpu.vector_store %arg9[%c1_28, %c0_29, %c0_30], %39 {strides = array<i32>} : memref<4x2x128xf32, #tpu.memory_space<vmem>>, vector<1x2x128xf32>,
    %c2 = arith.constant 2 : index
    %c0_31 = arith.constant 0 : index
    %c0_32 = arith.constant 0 : index
    %40 = vector.load %arg2[%c2, %c0_31, %c0_32] : memref<4x10x128xf32, #tpu.memory_space<vmem>>, vector<1x10x128xf32>
    %41 = vector.shape_cast %40 : vector<1x10x128xf32> to vector<10x128xf32>
    %42 = arith.mulf %7, %41 : vector<10x128xf32>
    %cst_33 = arith.constant dense<0.000000e+00> : vector<10x128xf32>
    %43 = tpu.matmul %8, %42, %cst_33 {dimension_numbers = #tpu.dot_dimension_numbers<[1], [0], [0], [1], [0, 0, 1, 1], [], []>} : vector<10x10xf32>, vector<10x128xf32>, vector<10x128xf32> -> vector<10x128xf32>
    %44 = vector.broadcast %9 : vector<10x1xf32> to vector<10x128xf32>
    %45 = arith.addf %43, %44 : vector<10x128xf32>
    %cst_34 = arith.constant 0.000000e+00 : f32
    %46 = vector.broadcast %cst_34 : f32 to vector<10x128xf32>
    %47 = arith.maximumf %45, %46 : vector<10x128xf32>
    %cst_35 = arith.constant dense<0.000000e+00> : vector<2x128xf32>
    %48 = tpu.matmul %10, %47, %cst_35 {dimension_numbers = #tpu.dot_dimension_numbers<[1], [0], [0], [1], [0, 0, 1, 1], [], []>} : vector<2x10xf32>, vector<10x128xf32>, vector<2x128xf32> -> vector<2x128xf32>
    %49 = vector.broadcast %11 : vector<2x1xf32> to vector<2x128xf32>
    %50 = arith.addf %48, %49 : vector<2x128xf32>
    %c2_36 = arith.constant 2 : index
    %c0_37 = arith.constant 0 : index
    %c0_38 = arith.constant 0 : index
    %51 = vector.load %arg9[%c2_36, %c0_37, %c0_38] : memref<4x2x128xf32, #tpu.memory_space<vmem>>, vector<1x2x128xf32>
    %52 = vector.shape_cast %51 : vector<1x2x128xf32> to vector<2x128xf32>
    %53 = vector.shape_cast %50 : vector<2x128xf32> to vector<1x2x128xf32>
    tpu.vector_store %arg9[%c2_36, %c0_37, %c0_38], %53 {strides = array<i32>} : memref<4x2x128xf32, #tpu.memory_space<vmem>>, vector<1x2x128xf32>,
    %c3 = arith.constant 3 : index
    %c0_39 = arith.constant 0 : index
    %c0_40 = arith.constant 0 : index
    %54 = vector.load %arg2[%c3, %c0_39, %c0_40] : memref<4x10x128xf32, #tpu.memory_space<vmem>>, vector<1x10x128xf32>
    %55 = vector.shape_cast %54 : vector<1x10x128xf32> to vector<10x128xf32>
    %56 = arith.mulf %7, %55 : vector<10x128xf32>
    %cst_41 = arith.constant dense<0.000000e+00> : vector<10x128xf32>
    %57 = tpu.matmul %8, %56, %cst_41 {dimension_numbers = #tpu.dot_dimension_numbers<[1], [0], [0], [1], [0, 0, 1, 1], [], []>} : vector<10x10xf32>, vector<10x128xf32>, vector<10x128xf32> -> vector<10x128xf32>
    %58 = vector.broadcast %9 : vector<10x1xf32> to vector<10x128xf32>
    %59 = arith.addf %57, %58 : vector<10x128xf32>
    %cst_42 = arith.constant 0.000000e+00 : f32
    %60 = vector.broadcast %cst_42 : f32 to vector<10x128xf32>
    %61 = arith.maximumf %59, %60 : vector<10x128xf32>
    %cst_43 = arith.constant dense<0.000000e+00> : vector<2x128xf32>
    %62 = tpu.matmul %10, %61, %cst_43 {dimension_numbers = #tpu.dot_dimension_numbers<[1], [0], [0], [1], [0, 0, 1, 1], [], []>} : vector<2x10xf32>, vector<10x128xf32>, vector<2x128xf32> -> vector<2x128xf32>
    %63 = vector.broadcast %11 : vector<2x1xf32> to vector<2x128xf32>
    %64 = arith.addf %62, %63 : vector<2x128xf32>
    %c3_44 = arith.constant 3 : index
    %c0_45 = arith.constant 0 : index
    %c0_46 = arith.constant 0 : index
    %65 = vector.load %arg9[%c3_44, %c0_45, %c0_46] : memref<4x2x128xf32, #tpu.memory_space<vmem>>, vector<1x2x128xf32>
    %66 = vector.shape_cast %65 : vector<1x2x128xf32> to vector<2x128xf32>
    %67 = vector.shape_cast %64 : vector<2x128xf32> to vector<1x2x128xf32>
    tpu.vector_store %arg9[%c3_44, %c0_45, %c0_46], %67 {strides = array<i32>} : memref<4x2x128xf32, #tpu.memory_space<vmem>>, vector<1x2x128xf32>,
    return
  }
  func.func @transform_0(%arg0: i32) -> (i32, i32) {
    %c0_i32 = arith.constant 0 : i32
    %c0_i32_0 = arith.constant 0 : i32
    return %c0_i32, %arg0 : i32, i32
  }
  func.func @transform_1(%arg0: i32) -> (i32, i32, i32) {
    %c0_i32 = arith.constant 0 : i32
    %c0_i32_0 = arith.constant 0 : i32
    %c0_i32_1 = arith.constant 0 : i32
    return %c0_i32, %c0_i32_0, %arg0 : i32, i32, i32
  }
  func.func @transform_2(%arg0: i32) -> (i32, i32) {
    %c0_i32 = arith.constant 0 : i32
    %c0_i32_0 = arith.constant 0 : i32
    %c0_i32_1 = arith.constant 0 : i32
    return %c0_i32, %c0_i32_0 : i32, i32
  }
  func.func @transform_3(%arg0: i32) -> (i32, i32) {
    %c0_i32 = arith.constant 0 : i32
    %c0_i32_0 = arith.constant 0 : i32
    %c0_i32_1 = arith.constant 0 : i32
    return %c0_i32, %c0_i32_0 : i32, i32
  }
  func.func @transform_4(%arg0: i32) -> (i32, i32) {
    %c0_i32 = arith.constant 0 : i32
    %c0_i32_0 = arith.constant 0 : i32
    %c0_i32_1 = arith.constant 0 : i32
    return %c0_i32, %c0_i32_0 : i32, i32
  }
  func.func @transform_5(%arg0: i32) -> (i32, i32) {
    %c0_i32 = arith.constant 0 : i32
    %c0_i32_0 = arith.constant 0 : i32
    %c0_i32_1 = arith.constant 0 : i32
    return %c0_i32, %c0_i32_0 : i32, i32
  }
  func.func @transform_6(%arg0: i32) -> (i32, i32) {
    %c0_i32 = arith.constant 0 : i32
    %c0_i32_0 = arith.constant 0 : i32
    %c0_i32_1 = arith.constant 0 : i32
    return %c0_i32, %c0_i32_0 : i32, i32
  }
  func.func @transform_7(%arg0: i32) -> (i32, i32) {
    %c0_i32 = arith.constant 0 : i32
    %c0_i32_0 = arith.constant 0 : i32
    %c0_i32_1 = arith.constant 0 : i32
    return %c0_i32, %c0_i32_0 : i32, i32
  }
  func.func @transform_8(%arg0: i32) -> (i32, i32, i32) {
    %c0_i32 = arith.constant 0 : i32
    %c0_i32_0 = arith.constant 0 : i32
    %c0_i32_1 = arith.constant 0 : i32
    return %c0_i32, %c0_i32_0, %arg0 : i32, i32, i32
  }
}

</mosaic_0001>

<bundles_post_ra>
// kernel: tpu_custom_call.1
= control target key start
LH: loop header
LB: loop body
LE: loop exit
PB: predicated region body
PF: predicated region fallthrough
CT: control target
= control target key end

     0   :  { %vm52_vm0 = vcmask 1041408   ;;  %vm45_vm1 = vcmask 15360   ;;  %v1013_v4 = vmov 0   ;;  %s1182_s0 = inlined_call_operand.vmem [shape: f32[2,128], index: 0, kind: input, shape index: {}]   ;;  %s1183_s1 = inlined_call_operand.vmem [shape: f32[4,10,128], index: 1, kind: input, shape index: {}]   ;;  %s1184_s2 = inlined_call_operand.vmem [shape: f32[10,2], index: 2, kind: input, shape index: {}]   ;;  %s1185_s3 = inlined_call_operand.vmem [shape: f32[10,1], index: 3, kind: input, shape index: {}]   ;;  %s1186_s4 = inlined_call_operand.vmem [shape: f32[10,10], index: 4, kind: input, shape index: {}]   ;;  %s1187_s5 = inlined_call_operand.vmem [shape: f32[10,1], index: 5, kind: input, shape index: {}]   ;;  %s1188_s6 = inlined_call_operand.vmem [shape: f32[2,10], index: 6, kind: input, shape index: {}]   ;;  %s1189_s7 = inlined_call_operand.vmem [shape: f32[2,1], index: 7, kind: input, shape index: {}]   ;;  %s1190_s8 = inlined_call_operand.hbm [shape: f32[4,2,128], index: 8, kind: output, shape index: {}]  }
   0x1   :  { %v30_v0 = vld [vmem:[%s1182_s0] sm:$0x3]  ;;  %v32_v2 = vld [vmem:[%s1184_s2 + $0x8] sm:$0x3]  ;;  %987 = vset.pattern.permute.xlu0 %v1013_v4 }
   0x2   :  { %v31_v1 = vld [vmem:[%s1184_s2] sm:$0xff]  ;;  %878 = vmatprep.subr.msk.mxu0 %vm52_vm0, %v30_v0 }
   0x3   :  { %880 = vmatprep.mubr.msk.f32.mxu0 %vm45_vm1, %v31_v1  ;;  %v33_v3 = vld [vmem:[%s1185_s3] sm:$0xff]  ;;  %879 = vmatpush3.msk.msra.mxu0 %vm52_vm0, %v30_v0 }
   0x4   :  { %13 = vsyncpa [#allocation3], 0  ;;  %881 = vmatmul.mubr.msk.f32.vlgmr.msra.gmra.mrb[0].mxu0 %vm45_vm1, %v32_v2  ;;  %37 = vperm.xlu0 %987, %v33_v3   ;;  %v34_v5 = vld [vmem:[%s1185_s3 + $0x8] sm:$0x3]  ;;  %v138_v6 = vld [vmem:[%s1189_s7] sm:$0x3] }
   0x5   :  { %988 = vset.pattern.permute.xlu1 %v1013_v4  ;;  %v133_v7 = vld [vmem:[%s1186_s4] sm:$0xff]  ;;  %vm153_vm2 = vcmask 80896   ;;  %v136_v9 = vld [vmem:[%s1187_s5 + $0x8] sm:$0x3]  ;;  %v827_v14 = vld [vmem:[%s1183_s1 + $0x18] sm:$0x3] }
   0x6   :  { %887 = vmatprep.mubr.msk.f32.mxu1 %vm153_vm2, %v133_v7  ;;  %v135_v8 = vld [vmem:[%s1187_s5] sm:$0xff]  ;;  %v834_v15 = vld [vmem:[%s1183_s1 + $0x28] sm:$0x3]  ;;  %v841_v17 = vld [vmem:[%s1183_s1 + $0x38] sm:$0x3]  ;;  %vm1014_vm3 = vmmov 1  }
   0x7   :  { %145 = vperm.xlu1 %988, %v135_v8   ;;  %v826_v19 = vld [vmem:[%s1183_s1 + $0x10] sm:$0xff]  ;;  %v140_v20 = vld [vmem:[%s1183_s1 + $0x8] sm:$0x3]  ;;  %v833_v22 = vld [vmem:[%s1183_s1 + $0x20] sm:$0xff]  ;;  %v1015_v40 = vmov 0.0|0.0   ;;  %vm1016_vm5 = vmmov 0  }
   0x8   :  { %42 = vperm.xlu0 %987, %v34_v5   ;;  %v840_v23 = vld [vmem:[%s1183_s1 + $0x30] sm:$0xff]  ;;  %v139_v24 = vld [vmem:[%s1183_s1] sm:$0xff]  ;;  %vm1121_vm4 = vmpackc.low %vm52_vm0, %vm1014_vm3  ;;  %945 = vmatprep.subr.bf16.mxu0 %v1015_v40  ;;  %v1017_v41 = vmov 0.0  }
   0x9   :  { %v134_v39 = vld [vmem:[%s1186_s4 + $0x8] sm:$0x3]  ;;  %894 = vmatprep.mubr.msk.f32.mxu0 %vm1016_vm5, %v1017_v41  ;;  %v137_v58 = vld [vmem:[%s1188_s6] sm:$0x3]  ;;  %s1018_s6 = smov [#allocation2]  }
   0xa   :  { %s807_s13 = sshll.u32 %s1018_s6, 4  ;;  %s808_s13 = int_to_ptr.vmem [resolvable:$true] %s807_s13 }
   0xb   :  { %150 = vperm.xlu1 %988, %v136_v9   ;;  %s989_s14 = scalar_lea.vmem %s808_s13, 128  ;;  %p994_p1 = scmp.lt.s32.totalorder %s808_s13, %s808_s13 }
   0xc   :  { %242 = vperm.xlu0 %987, %v138_v6   ;;  %p990_p0 = scmp.ne.s32.totalorder %s808_s13, %s989_s14  ;;  %p995_p2 = scmp.lt.s32.totalorder %s989_s14, %s989_s14 }
   0xe   :  { %p996_p3 = por %p995_p2, %p994_p1 }
  0x10   :  { %p997_p4 = pnand %p996_p3, %p990_p0 }
  0x83   :  { %v38_v10 = vpop.permute.xlu0 %37 }
  0x86   :  { %v146_v42 = vpop.permute.xlu1 %145 }
  0x87   :  { %v43_v11 = vpop.permute.xlu0 %42 }
  0x8a   :  { %v151_v43 = vpop.permute.xlu1 %150 }
  0x8b   :  { %v243_v9 = vpop.permute.xlu0 %242 }
  0xd7   :  { %v882_v12 = vpop.f32.mrb[0].mxu0 }
  0xd8   :  { %v128_v13 = vadd.f32 %v882_v12, %v43_v11  ;;  %v122_v16 = vpop.f32.mrb[1].mxu0 }
  0xd9   :  { %v123_v18 = vadd.f32 %v122_v16, %v38_v10 }
  0xda   :  { %v132_v21 = vmax.f32 %v128_v13, 0.0 }
  0xdb   :  { %v131_v25 = vmax.f32 %v123_v18, 0.0 }
  0xdc   :  { %v326_v26 = vmul.f32 %v827_v14, %v132_v21  ;;  %v486_v27 = vmul.f32 %v834_v15, %v132_v21  ;;  %v646_v28 = vmul.f32 %v841_v17, %v132_v21  ;;  %v142_v29 = vmul.f32 %v140_v20, %v132_v21 }
  0xdd   :  { %v325_v30 = vmul.f32 %v826_v19, %v131_v25  ;;  %v485_v31 = vmul.f32 %v833_v22, %v131_v25  ;;  %v645_v32 = vmul.f32 %v840_v23, %v131_v25  ;;  %v141_v33 = vmul.f32 %v139_v24, %v131_v25 }
  0xdf   :  { %v939_v35 = vpack.c.bf16 %v142_v29, %v141_v33  ;;  %v949_v36 = vpack.c.bf16 %v326_v26, %v325_v30  ;;  %v959_v37 = vpack.c.bf16 %v486_v27, %v485_v31  ;;  %v969_v38 = vpack.c.bf16 %v646_v28, %v645_v32 }
  0xe1   :  { %941 = vmatprep.subr.msk.bf16.mxu1 %vm1121_vm4, %v939_v35 }
  0xe2   :  { %944 = vmatpush3.bf16.msk.msra.mxu1 %vm1121_vm4, %v939_v35 }
  0xe3   :  { %951 = vmatprep.subr.msk.bf16.mxu1 %vm1121_vm4, %v949_v36 }
  0xe5   :  { %888 = vmatmul.mubr.msk.f32.vlgmr.msra.gmra.mrb[0].mxu1 %vm153_vm2, %v134_v39 }
  0xe6   :  { %954 = vmatpush3.bf16.msk.msra.mxu1 %vm1121_vm4, %v949_v36  ;;  %901 = vmatprep.mubr.msk.f32.mxu1 %vm153_vm2, %v133_v7 }
  0xe7   :  { %961 = vmatprep.subr.msk.bf16.mxu1 %vm1121_vm4, %v959_v37 }
  0xe9   :  { %902 = vmatmul.mubr.msk.f32.vlgmr.msra.gmra.mrb[2].mxu1 %vm153_vm2, %v134_v39 }
  0xea   :  { %964 = vmatpush3.bf16.msk.msra.mxu1 %vm1121_vm4, %v959_v37  ;;  %915 = vmatprep.mubr.msk.f32.mxu1 %vm153_vm2, %v133_v7 }
  0xeb   :  { %971 = vmatprep.subr.msk.bf16.mxu1 %vm1121_vm4, %v969_v38 }
  0xed   :  { %916 = vmatmul.mubr.msk.f32.vlgmr.msra.gmra.mrb[4].mxu1 %vm153_vm2, %v134_v39 }
  0xee   :  { %974 = vmatpush3.bf16.msk.msra.mxu1 %vm1121_vm4, %v969_v38  ;;  %929 = vmatprep.mubr.msk.f32.mxu1 %vm153_vm2, %v133_v7 }
  0xf1   :  { %930 = vmatmul.mubr.msk.f32.vlgmr.msra.gmra.mrb[6].mxu1 %vm153_vm2, %v134_v39 }
 0x1b8   :  { %v889_v44 = vpop.f32.mrb[0].mxu1 }
 0x1b9   :  { %v235_v45 = vadd.f32 %v889_v44, %v151_v43  ;;  %v229_v46 = vpop.f32.mrb[1].mxu1 }
 0x1ba   :  { %v230_v47 = vadd.f32 %v229_v46, %v146_v42 }
 0x1bb   :  { %v239_v48 = vmax.f32 %v235_v45, 0.0 }
 0x1bc   :  { %v238_v49 = vmax.f32 %v230_v47, 0.0  ;;  %v903_v50 = vpop.f32.mrb[2].mxu1 }
 0x1bd   :  { %v402_v51 = vadd.f32 %v903_v50, %v151_v43  ;;  %v396_v52 = vpop.f32.mrb[3].mxu1 }
 0x1be   :  { %v946_v53 = vpack.c.bf16 %v239_v48, %v238_v49  ;;  %v397_v54 = vadd.f32 %v396_v52, %v146_v42 }
 0x1bf   :  { %v406_v55 = vmax.f32 %v402_v51, 0.0 }
 0x1c0   :  { %v405_v56 = vmax.f32 %v397_v54, 0.0  ;;  %948 = vmatpush3.bf16.msk.msra.mxu0 %vm1121_vm4, %v946_v53  ;;  %v917_v57 = vpop.f32.mrb[4].mxu1 }
 0x1c1   :  { %v562_v59 = vadd.f32 %v917_v57, %v151_v43  ;;  %v556_v60 = vpop.f32.mrb[5].mxu1  ;;  %955 = vmatprep.subr.bf16.mxu0 %v1015_v40 }
 0x1c2   :  { %v956_v61 = vpack.c.bf16 %v406_v55, %v405_v56  ;;  %v557_v62 = vadd.f32 %v556_v60, %v146_v42 }
 0x1c3   :  { %v566_v63 = vmax.f32 %v562_v59, 0.0  ;;  %895 = vmatmul.mubr.msk.f32.vlgmr.msra.gmra.mrb[2].mxu0 %vm153_vm2, %v137_v58 }
 0x1c4   :  { %v565_v0 = vmax.f32 %v557_v62, 0.0  ;;  %958 = vmatpush3.bf16.msk.msra.mxu0 %vm1121_vm4, %v956_v61  ;;  %v931_v1 = vpop.f32.mrb[6].mxu1  ;;  %908 = vmatprep.mubr.msk.f32.mxu0 %vm1016_vm5, %v1017_v41 }
 0x1c5   :  { %v722_v2 = vadd.f32 %v931_v1, %v151_v43  ;;  %v716_v3 = vpop.f32.mrb[7].mxu1  ;;  %965 = vmatprep.subr.bf16.mxu0 %v1015_v40 }
 0x1c6   :  { %v966_v4 = vpack.c.bf16 %v566_v63, %v565_v0  ;;  %v717_v5 = vadd.f32 %v716_v3, %v146_v42 }
 0x1c7   :  { %v726_v6 = vmax.f32 %v722_v2, 0.0  ;;  %909 = vmatmul.mubr.msk.f32.vlgmr.msra.gmra.mrb[4].mxu0 %vm153_vm2, %v137_v58 }
 0x1c8   :  { %v725_v7 = vmax.f32 %v717_v5, 0.0  ;;  %968 = vmatpush3.bf16.msk.msra.mxu0 %vm1121_vm4, %v966_v4  ;;  %922 = vmatprep.mubr.msk.f32.mxu0 %vm1016_vm5, %v1017_v41 }
 0x1c9   :  { %975 = vmatprep.subr.bf16.mxu0 %v1015_v40 }
 0x1ca   :  { %v976_v8 = vpack.c.bf16 %v726_v6, %v725_v7 }
 0x1cb   :  { %923 = vmatmul.mubr.msk.f32.vlgmr.msra.gmra.mrb[6].mxu0 %vm153_vm2, %v137_v58 }
 0x1cc   :  { %978 = vmatpush3.bf16.msk.msra.mxu0 %vm1121_vm4, %v976_v8  ;;  %936 = vmatprep.mubr.msk.f32.mxu0 %vm1016_vm5, %v1017_v41 }
 0x1cf   :  { %937 = vmatmul.mubr.msk.f32.vlgmr.msra.gmra.mrb[8].mxu0 %vm153_vm2, %v137_v58 }
 0x296   :  { %v317_v10 = vpop.f32.mrb[2].mxu0 }
 0x297   :  { %v318_v11 = vadd.f32 %v317_v10, %v243_v9  ;;  %v896_v12 = vpop.f32.mrb[3].mxu0 }
 0x299   :  { %321 = vst [vmem:[#allocation2] sm:$0x3] %v318_v11 }
 0x29a   :  { %v476_v13 = vpop.f32.mrb[4].mxu0 }
 0x29b   :  { %v477_v14 = vadd.f32 %v476_v13, %v243_v9  ;;  %v910_v15 = vpop.f32.mrb[5].mxu0 }
 0x29d   :  { %481 = vst [vmem:[#allocation2 + $0x2] sm:$0x3] %v477_v14 }
 0x29e   :  { %v636_v16 = vpop.f32.mrb[6].mxu0 }
 0x29f   :  { %v637_v17 = vadd.f32 %v636_v16, %v243_v9  ;;  %v924_v18 = vpop.f32.mrb[7].mxu0 }
 0x2a1   :  { %641 = vst [vmem:[#allocation2 + $0x4] sm:$0x3] %v637_v17 }
 0x2a2   :  { %v796_v19 = vpop.f32.mrb[8].mxu0 }
 0x2a3   :  { %v797_v20 = vadd.f32 %v796_v19, %v243_v9  ;;  %v938_v21 = vpop.f32.mrb[9].mxu0 }
 0x2a5   :  { %801 = vst [vmem:[#allocation2 + $0x6] sm:$0x3] %v797_v20 }
 0x2a6   :  { %1000 = shalt.err (!%p997_p4)
}
 0x2a7   :  { %s1001_s16 = scalar_lea.hbm %s1190_s8, 128 }
 0x2a8   :  { %p1002_p5 = scmp.ne.s32.totalorder %s1190_s8, %s1001_s16  ;;  %p1005_p6 = scmp.lt.u32.totalorder %s1001_s16, %s1190_s8 }
 0x2aa   :  { %p1007_p7 = pnand %p1005_p6, %p1002_p5 }
 0x2ac   :  { %1010 = shalt.err (!%p1007_p7)
}
 0x2ad   :  { %s1019_s7 = smov 32   ;;  %s1020_s20 = smov 2  }
 0x2ae   :  { %813 = dma.vmem_to_hbm [thread:$0]  %s808_s13, 128, %s1190_s8, [#allocation3], %s1019_s7, %s1019_s7, %s1020_s20  }
 0x2af   :  { %1011 = dma.done.wait [#allocation3], 128  }
 0x2b0   :  { %1012 = vsyncadd [#allocation3], 4294967168 }
 0x2b1   :  { %817 = vsyncpa [#allocation3], 1 }

</bundles_post_ra>
